<compile_context>
chip_gen: v7x
topology: tpu7x:2x2x1
jax: 0.10.0
libtpu: 0.0.40
codegen_flags: <defaults>
</compile_context>

<pallas_src>
import jax
import jax.numpy as jnp
from jax.experimental import pallas as pl
from jax.experimental.pallas import tpu as pltpu

NUMBER_OF_CLASSES = 10
DIMS = (200, 150, 100, 50, NUMBER_OF_CLASSES)
LANE = 128


def _round_up(n, m):
    return ((n + m - 1) // m) * m


# Lane-aligned (128-multiple) feature dims: (256, 256, 128, 128, 128)
PADDED_DIMS = tuple(_round_up(d, LANE) for d in DIMS)


def mlp_kernel(x_ref,
               w1_ref, b1_ref,
               w2_ref, b2_ref,
               w3_ref, b3_ref,
               w4_ref, b4_ref,
               o_ref):
    # bf16 operands -> MXU, f32 accumulation; bias add / ReLU on VPU, tanh on EUP.
    h = jnp.dot(x_ref[...], w1_ref[...], preferred_element_type=jnp.float32) + b1_ref[...]
    h = jnp.maximum(h, 0.0).astype(jnp.bfloat16)                       # ReLU
    h = jnp.dot(h, w2_ref[...], preferred_element_type=jnp.float32) + b2_ref[...]
    h = jnp.maximum(h, 0.0).astype(jnp.bfloat16)                       # ReLU
    h = jnp.dot(h, w3_ref[...], preferred_element_type=jnp.float32) + b3_ref[...]
    h = jnp.tanh(h).astype(jnp.bfloat16)                               # Tanh
    o = jnp.dot(h, w4_ref[...], preferred_element_type=jnp.float32) + b4_ref[...]
    o_ref[...] = o.astype(o_ref.dtype)


def _pad2(a, rows, cols):
    r, c = a.shape
    return jnp.pad(a, ((0, rows - r), (0, cols - c)))


def mlp_forward(x, params, *, tb=512):
    """x: (B, 200) f32.  params: list of 4 (w:(in,out), b:(out,)) f32 arrays."""
    B, d_in = x.shape
    assert d_in == DIMS[0]

    # Batch tile: multiple of 8 sublanes, capped at `tb` (~512 rows keeps the
    # double-buffered x/out tiles well under the 32 MiB scoped VMEM on v7x).
    tb = int(min(tb, max(8, _round_up(B, 8))))
    b_pad = _round_up(B, tb)
    grid = (b_pad // tb,)

    # Pad batch + input features, cast activations/weights to bf16 once here.
    x_p = jnp.pad(x.astype(jnp.bfloat16), ((0, b_pad - B), (0, PADDED_DIMS[0] - d_in)))

    flat = [x_p]
    in_specs = [pl.BlockSpec((tb, PADDED_DIMS[0]), lambda i: (i, 0))]
    for li, (w, b) in enumerate(params):
        kp, np_ = PADDED_DIMS[li], PADDED_DIMS[li + 1]
        w_p = _pad2(w.astype(jnp.float32), kp, np_).astype(jnp.bfloat16)
        b_p = jnp.pad(b.reshape(1, -1).astype(jnp.float32), ((0, 0), (0, np_ - b.shape[-1])))
        flat += [w_p, b_p]
        # Constant index_map -> weight/bias tiles stay resident in VMEM across grid steps.
        in_specs += [pl.BlockSpec((kp, np_), lambda i: (0, 0)),
                     pl.BlockSpec((1, np_), lambda i: (0, 0))]

    out_cols = PADDED_DIMS[-1]
    flops = 2 * b_pad * sum(PADDED_DIMS[i] * PADDED_DIMS[i + 1] for i in range(4))
    weight_bytes = sum(int(a.size) * a.dtype.itemsize for a in flat[1:])
    bytes_accessed = int(x_p.size) * 2 + weight_bytes + b_pad * out_cols * 4
    cost = pl.CostEstimate(flops=int(flops),
                           transcendentals=int(b_pad * PADDED_DIMS[3]),
                           bytes_accessed=int(bytes_accessed))

    out_p = pl.pallas_call(
        mlp_kernel,
        out_shape=jax.ShapeDtypeStruct((b_pad, out_cols), jnp.float32),
        grid=grid,
        in_specs=in_specs,
        out_specs=pl.BlockSpec((tb, out_cols), lambda i: (i, 0)),
        compiler_params=pltpu.CompilerParams(
            dimension_semantics=("parallel",),        # shard batch tiles across v7x's 2 TCs
            vmem_limit_bytes=32 * 1024 * 1024,
        ),
        cost_estimate=cost,
    )(*flat)

    # Drop batch padding and the padded class columns (lane-dense store inside
    # the kernel; cheap slice out here).
    return out_p[:B, :NUMBER_OF_CLASSES]


def init_params(key):
    """torch.nn.Linear default init: U(-1/sqrt(fan_in), 1/sqrt(fan_in)); weights stored (in, out)."""
    params = []
    for i in range(len(DIMS) - 1):
        fan_in, fan_out = DIMS[i], DIMS[i + 1]
        key, kw, kb = jax.random.split(key, 3)
        bound = 1.0 / jnp.sqrt(fan_in)
        w = jax.random.uniform(kw, (fan_in, fan_out), jnp.float32, -bound, bound)
        b = jax.random.uniform(kb, (fan_out,), jnp.float32, -bound, bound)
        params.append((w, b))
    return params


def mlp_reference(x, params):
    """Pure-JAX reference replicating the kernel numerics (bf16 operands, f32 accumulate)."""
    hp = jax.lax.Precision.HIGHEST
    acts = [jax.nn.relu, jax.nn.relu, jnp.tanh, None]
    h = x.astype(jnp.bfloat16).astype(jnp.float32)
    for (w, b), act in zip(params, acts):
        w32 = w.astype(jnp.bfloat16).astype(jnp.float32)
        h = jnp.dot(h, w32, precision=hp) + b.astype(jnp.float32)
        if act is not None:
            h = act(h).astype(jnp.bfloat16).astype(jnp.float32)
    return h


if __name__ == "__main__":
    key = jax.random.PRNGKey(0)
    key, kx = jax.random.split(key)
    B = 8
    x = jax.random.normal(kx, (B, DIMS[0]), jnp.float32)
    params = init_params(key)

    out = jax.block_until_ready(mlp_forward(x, params))
    ref = mlp_reference(x, params)

    assert out.shape == (B, NUMBER_OF_CLASSES)
    max_err = float(jnp.max(jnp.abs(out - ref)))
    assert jnp.allclose(out, ref, atol=2e-2, rtol=2e-2), f"max abs err {max_err}"

    print("KERNEL_OK")
</pallas_src>

<mosaic_0001>
module attributes {stable_mosaic.version = 11 : i64} {
  func.func @mlp_kernel(%arg0: i32, %arg1: memref<8x256xbf16, #tpu.memory_space<vmem>>, %arg2: memref<256x256xbf16, #tpu.memory_space<vmem>>, %arg3: memref<1x256xf32, #tpu.memory_space<vmem>>, %arg4: memref<256x128xbf16, #tpu.memory_space<vmem>>, %arg5: memref<1x128xf32, #tpu.memory_space<vmem>>, %arg6: memref<128x128xbf16, #tpu.memory_space<vmem>>, %arg7: memref<1x128xf32, #tpu.memory_space<vmem>>, %arg8: memref<128x128xbf16, #tpu.memory_space<vmem>>, %arg9: memref<1x128xf32, #tpu.memory_space<vmem>>, %arg10: memref<8x128xf32, #tpu.memory_space<vmem>>) attributes {dimension_semantics = [#tpu.dimension_semantics<parallel>], iteration_bounds = array<i64: 1>, scalar_prefetch = 0 : i64, scratch_operands = 0 : i64, tpu.core_type = #tpu.core_type<tc>, window_params = [{transform_indices = @transform_0, window_bounds = array<i64: 8, 256>}, {pipeline_mode = #tpu.pipeline_mode<synchronous>, transform_indices = @transform_1, window_bounds = array<i64: 256, 256>}, {pipeline_mode = #tpu.pipeline_mode<synchronous>, transform_indices = @transform_2, window_bounds = array<i64: 1, 256>}, {pipeline_mode = #tpu.pipeline_mode<synchronous>, transform_indices = @transform_3, window_bounds = array<i64: 256, 128>}, {pipeline_mode = #tpu.pipeline_mode<synchronous>, transform_indices = @transform_4, window_bounds = array<i64: 1, 128>}, {pipeline_mode = #tpu.pipeline_mode<synchronous>, transform_indices = @transform_5, window_bounds = array<i64: 128, 128>}, {pipeline_mode = #tpu.pipeline_mode<synchronous>, transform_indices = @transform_6, window_bounds = array<i64: 1, 128>}, {pipeline_mode = #tpu.pipeline_mode<synchronous>, transform_indices = @transform_7, window_bounds = array<i64: 128, 128>}, {pipeline_mode = #tpu.pipeline_mode<synchronous>, transform_indices = @transform_8, window_bounds = array<i64: 1, 128>}, {transform_indices = @transform_9, window_bounds = array<i64: 8, 128>}]} {
    %c0 = arith.constant 0 : index
    %c0_0 = arith.constant 0 : index
    %0 = vector.load %arg1[%c0, %c0_0] : memref<8x256xbf16, #tpu.memory_space<vmem>>, vector<8x256xbf16>
    %c0_1 = arith.constant 0 : index
    %c0_2 = arith.constant 0 : index
    %1 = vector.load %arg2[%c0_1, %c0_2] : memref<256x256xbf16, #tpu.memory_space<vmem>>, vector<256x256xbf16>
    %cst = arith.constant dense<0.000000e+00> : vector<8x256xf32>
    %2 = tpu.matmul %0, %1, %cst {dimension_numbers = #tpu.dot_dimension_numbers<[1], [0], [0], [1], [0, 0, 1, 1], [], []>} : vector<8x256xbf16>, vector<256x256xbf16>, vector<8x256xf32> -> vector<8x256xf32>
    %c0_3 = arith.constant 0 : index
    %c0_4 = arith.constant 0 : index
    %3 = vector.load %arg3[%c0_3, %c0_4] : memref<1x256xf32, #tpu.memory_space<vmem>>, vector<1x256xf32>
    %4 = vector.broadcast %3 : vector<1x256xf32> to vector<8x256xf32>
    %5 = arith.addf %2, %4 : vector<8x256xf32>
    %cst_5 = arith.constant 0.000000e+00 : f32
    %6 = vector.broadcast %cst_5 : f32 to vector<8x256xf32>
    %7 = arith.maximumf %5, %6 : vector<8x256xf32>
    %8 = arith.truncf %7 : vector<8x256xf32> to vector<8x256xbf16>
    %c0_6 = arith.constant 0 : index
    %c0_7 = arith.constant 0 : index
    %9 = vector.load %arg4[%c0_6, %c0_7] : memref<256x128xbf16, #tpu.memory_space<vmem>>, vector<256x128xbf16>
    %cst_8 = arith.constant dense<0.000000e+00> : vector<8x128xf32>
    %10 = tpu.matmul %8, %9, %cst_8 {dimension_numbers = #tpu.dot_dimension_numbers<[1], [0], [0], [1], [0, 0, 1, 1], [], []>} : vector<8x256xbf16>, vector<256x128xbf16>, vector<8x128xf32> -> vector<8x128xf32>
    %c0_9 = arith.constant 0 : index
    %c0_10 = arith.constant 0 : index
    %11 = vector.load %arg5[%c0_9, %c0_10] : memref<1x128xf32, #tpu.memory_space<vmem>>, vector<1x128xf32>
    %12 = vector.broadcast %11 : vector<1x128xf32> to vector<8x128xf32>
    %13 = arith.addf %10, %12 : vector<8x128xf32>
    %cst_11 = arith.constant 0.000000e+00 : f32
    %14 = vector.broadcast %cst_11 : f32 to vector<8x128xf32>
    %15 = arith.maximumf %13, %14 : vector<8x128xf32>
    %16 = arith.truncf %15 : vector<8x128xf32> to vector<8x128xbf16>
    %c0_12 = arith.constant 0 : index
    %c0_13 = arith.constant 0 : index
    %17 = vector.load %arg6[%c0_12, %c0_13] : memref<128x128xbf16, #tpu.memory_space<vmem>>, vector<128x128xbf16>
    %cst_14 = arith.constant dense<0.000000e+00> : vector<8x128xf32>
    %18 = tpu.matmul %16, %17, %cst_14 {dimension_numbers = #tpu.dot_dimension_numbers<[1], [0], [0], [1], [0, 0, 1, 1], [], []>} : vector<8x128xbf16>, vector<128x128xbf16>, vector<8x128xf32> -> vector<8x128xf32>
    %c0_15 = arith.constant 0 : index
    %c0_16 = arith.constant 0 : index
    %19 = vector.load %arg7[%c0_15, %c0_16] : memref<1x128xf32, #tpu.memory_space<vmem>>, vector<1x128xf32>
    %20 = vector.broadcast %19 : vector<1x128xf32> to vector<8x128xf32>
    %21 = arith.addf %18, %20 : vector<8x128xf32>
    %22 = math.tanh %21 : vector<8x128xf32>
    %23 = arith.truncf %22 : vector<8x128xf32> to vector<8x128xbf16>
    %c0_17 = arith.constant 0 : index
    %c0_18 = arith.constant 0 : index
    %24 = vector.load %arg8[%c0_17, %c0_18] : memref<128x128xbf16, #tpu.memory_space<vmem>>, vector<128x128xbf16>
    %cst_19 = arith.constant dense<0.000000e+00> : vector<8x128xf32>
    %25 = tpu.matmul %23, %24, %cst_19 {dimension_numbers = #tpu.dot_dimension_numbers<[1], [0], [0], [1], [0, 0, 1, 1], [], []>} : vector<8x128xbf16>, vector<128x128xbf16>, vector<8x128xf32> -> vector<8x128xf32>
    %c0_20 = arith.constant 0 : index
    %c0_21 = arith.constant 0 : index
    %26 = vector.load %arg9[%c0_20, %c0_21] : memref<1x128xf32, #tpu.memory_space<vmem>>, vector<1x128xf32>
    %27 = vector.broadcast %26 : vector<1x128xf32> to vector<8x128xf32>
    %28 = arith.addf %25, %27 : vector<8x128xf32>
    %c0_22 = arith.constant 0 : index
    %c0_23 = arith.constant 0 : index
    %29 = vector.load %arg10[%c0_22, %c0_23] : memref<8x128xf32, #tpu.memory_space<vmem>>, vector<8x128xf32>
    tpu.vector_store %arg10[%c0_22, %c0_23], %28 {strides = array<i32>} : memref<8x128xf32, #tpu.memory_space<vmem>>, vector<8x128xf32>,
    return
  }
  func.func @transform_0(%arg0: i32) -> (i32, i32) {
    %c0_i32 = arith.constant 0 : i32
    %c0_i32_0 = arith.constant 0 : i32
    return %arg0, %c0_i32 : i32, i32
  }
  func.func @transform_1(%arg0: i32) -> (i32, i32) {
    %c0_i32 = arith.constant 0 : i32
    %c0_i32_0 = arith.constant 0 : i32
    %c0_i32_1 = arith.constant 0 : i32
    return %c0_i32, %c0_i32_0 : i32, i32
  }
  func.func @transform_2(%arg0: i32) -> (i32, i32) {
    %c0_i32 = arith.constant 0 : i32
    %c0_i32_0 = arith.constant 0 : i32
    %c0_i32_1 = arith.constant 0 : i32
    return %c0_i32, %c0_i32_0 : i32, i32
  }
  func.func @transform_3(%arg0: i32) -> (i32, i32) {
    %c0_i32 = arith.constant 0 : i32
    %c0_i32_0 = arith.constant 0 : i32
    %c0_i32_1 = arith.constant 0 : i32
    return %c0_i32, %c0_i32_0 : i32, i32
  }
  func.func @transform_4(%arg0: i32) -> (i32, i32) {
    %c0_i32 = arith.constant 0 : i32
    %c0_i32_0 = arith.constant 0 : i32
    %c0_i32_1 = arith.constant 0 : i32
    return %c0_i32, %c0_i32_0 : i32, i32
  }
  func.func @transform_5(%arg0: i32) -> (i32, i32) {
    %c0_i32 = arith.constant 0 : i32
    %c0_i32_0 = arith.constant 0 : i32
    %c0_i32_1 = arith.constant 0 : i32
    return %c0_i32, %c0_i32_0 : i32, i32
  }
  func.func @transform_6(%arg0: i32) -> (i32, i32) {
    %c0_i32 = arith.constant 0 : i32
    %c0_i32_0 = arith.constant 0 : i32
    %c0_i32_1 = arith.constant 0 : i32
    return %c0_i32, %c0_i32_0 : i32, i32
  }
  func.func @transform_7(%arg0: i32) -> (i32, i32) {
    %c0_i32 = arith.constant 0 : i32
    %c0_i32_0 = arith.constant 0 : i32
    %c0_i32_1 = arith.constant 0 : i32
    return %c0_i32, %c0_i32_0 : i32, i32
  }
  func.func @transform_8(%arg0: i32) -> (i32, i32) {
    %c0_i32 = arith.constant 0 : i32
    %c0_i32_0 = arith.constant 0 : i32
    %c0_i32_1 = arith.constant 0 : i32
    return %c0_i32, %c0_i32_0 : i32, i32
  }
  func.func @transform_9(%arg0: i32) -> (i32, i32) {
    %c0_i32 = arith.constant 0 : i32
    %c0_i32_0 = arith.constant 0 : i32
    return %arg0, %c0_i32 : i32, i32
  }
}

</mosaic_0001>

<bundles_post_ra>
// kernel: tpu_custom_call.1
= control target key start
LH: loop header
LB: loop body
LE: loop exit
PB: predicated region body
PF: predicated region fallthrough
CT: control target
= control target key end

     0   :  { %14 = vsyncpa [#allocation3], 0  ;;  %s1340_s0 = inlined_call_operand.hbm [shape: bf16[8,256], index: 0, kind: input, shape index: {}]   ;;  %s1341_s1 = inlined_call_operand.hbm [shape: bf16[256,256], index: 1, kind: input, shape index: {}]   ;;  %s1342_s2 = inlined_call_operand.vmem [shape: f32[1,256], index: 2, kind: input, shape index: {}]   ;;  %s1343_s3 = inlined_call_operand.hbm [shape: bf16[256,128], index: 3, kind: input, shape index: {}]   ;;  %s1344_s4 = inlined_call_operand.vmem [shape: f32[1,128], index: 4, kind: input, shape index: {}]   ;;  %s1345_s5 = inlined_call_operand.hbm [shape: bf16[128,128], index: 5, kind: input, shape index: {}]   ;;  %s1346_s6 = inlined_call_operand.vmem [shape: f32[1,128], index: 6, kind: input, shape index: {}]   ;;  %s1347_s7 = inlined_call_operand.hbm [shape: bf16[128,128], index: 7, kind: input, shape index: {}]   ;;  %s1348_s8 = inlined_call_operand.vmem [shape: f32[1,128], index: 8, kind: input, shape index: {}]   ;;  %s1349_s9 = inlined_call_operand.hbm [shape: f32[8,128], index: 9, kind: output, shape index: {}]  }
   0x1   :  { %15 = vsyncpa [#allocation6], 0 }
   0x2   :  { %16 = vsyncpa [#allocation9], 0 }
   0x3   :  { %17 = vsyncpa [#allocation4], 0  ;;  %s1161_s30 = smov [#allocation5]   ;;  %s1021_s13 = scalar_lea.hbm %s1341_s1, 4096 }
   0x4   :  { %s33_s10 = sshll.u32 %s1161_s30, 4  ;;  %p1022_p0 = scmp.ne.s32.totalorder %s1341_s1, %s1021_s13  ;;  %s34_s10 = int_to_ptr.vmem [resolvable:$true] %s33_s10 }
   0x5   :  { %p1025_p1 = scmp.lt.u32.totalorder %s1021_s13, %s1341_s1 }
   0x7   :  { %p1027_p2 = pnand %p1025_p1, %p1022_p0 }
   0x9   :  { %1030 = shalt.err (!%p1027_p2)
}
   0xa   :  { %s1031_s18 = scalar_lea.vmem %s34_s10, 4096  ;;  %p1036_p4 = scmp.lt.s32.totalorder %s34_s10, %s34_s10 }
   0xb   :  { %p1032_p3 = scmp.ne.s32.totalorder %s34_s10, %s1031_s18  ;;  %p1037_p5 = scmp.lt.s32.totalorder %s1031_s18, %s1031_s18 }
   0xd   :  { %p1038_p6 = por %p1037_p5, %p1036_p4 }
   0xf   :  { %p1039_p7 = pnand %p1038_p6, %p1032_p3 }
  0x11   :  { %1042 = shalt.err (!%p1039_p7)
}
  0x12   :  { %s1162_s19 = smov 128   ;;  %s1163_s20 = smov 8  }
  0x13   :  { %39 = dma.hbm_to_vmem [thread:$0]  %s1341_s1, 4096, %s34_s10, [#allocation6], %s1162_s19, %s1162_s19, %s1163_s20  }
  0x14   :  { %s1164_s23 = smov [#allocation8]   ;;  %s1165_s25 = smov [#allocation2]  }
  0x15   :  { %s61_s24 = sshll.u32 %s1164_s23, 4  ;;  %s24_s26 = sshll.u32 %s1165_s25, 4  ;;  %s62_s24 = int_to_ptr.vmem [resolvable:$true] %s61_s24  ;;  %s25_s26 = int_to_ptr.vmem [resolvable:$true] %s24_s26 }
  0x16   :  { %s1043_s29 = scalar_lea.hbm %s1345_s5, 1024 }
  0x17   :  { %p1044_p8 = scmp.ne.s32.totalorder %s1345_s5, %s1043_s29  ;;  %p1047_p9 = scmp.lt.u32.totalorder %s1043_s29, %s1345_s5 }
  0x19   :  { %p1049_p10 = pnand %p1047_p9, %p1044_p8 }
  0x1b   :  { %1052 = shalt.err (!%p1049_p10)
}
  0x1c   :  { %s1053_s1 = scalar_lea.vmem %s62_s24, 1024  ;;  %p1058_p12 = scmp.lt.s32.totalorder %s62_s24, %s62_s24 }
  0x1d   :  { %p1054_p11 = scmp.ne.s32.totalorder %s62_s24, %s1053_s1  ;;  %p1059_p13 = scmp.lt.s32.totalorder %s1053_s1, %s1053_s1 }
  0x1f   :  { %p1060_p0 = por %p1059_p13, %p1058_p12 }
  0x21   :  { %p1061_p1 = pnand %p1060_p0, %p1054_p11 }
  0x23   :  { %1064 = shalt.err (!%p1061_p1)
}
  0x24   :  { %s1166_s10 = smov 64   ;;  %s1167_s14 = smov 4  }
  0x25   :  { %67 = dma.hbm_to_vmem [thread:$0]  %s1345_s5, 1024, %s62_s24, [#allocation9], %s1166_s10, %s1166_s10, %s1167_s14  }
  0x26   :  { %s1065_s19 = scalar_lea.hbm %s1340_s0, 128 }
  0x27   :  { %p1066_p2 = scmp.ne.s32.totalorder %s1340_s0, %s1065_s19  ;;  %p1069_p3 = scmp.lt.u32.totalorder %s1065_s19, %s1340_s0 }
  0x29   :  { %p1071_p4 = pnand %p1069_p3, %p1066_p2 }
  0x2b   :  { %1074 = shalt.err (!%p1071_p4)
}
  0x2c   :  { %s1075_s25 = scalar_lea.vmem %s25_s26, 128  ;;  %p1080_p6 = scmp.lt.s32.totalorder %s25_s26, %s25_s26 }
  0x2d   :  { %p1076_p5 = scmp.ne.s32.totalorder %s25_s26, %s1075_s25  ;;  %p1081_p7 = scmp.lt.s32.totalorder %s1075_s25, %s1075_s25 }
  0x2f   :  { %p1082_p8 = por %p1081_p7, %p1080_p6 }
  0x31   :  { %p1083_p9 = pnand %p1082_p8, %p1076_p5 }
  0x33   :  { %1086 = shalt.err (!%p1083_p9)
}
  0x34   :  { %27 = dma.hbm_to_vmem [thread:$0]  %s1340_s0, 128, %s25_s26, [#allocation3]  }
  0x35   :  { %s1168_s27 = smov [#allocation7]   ;;  %s1169_s29 = smov [#allocation10]  }
  0x36   :  { %s47_s28 = sshll.u32 %s1168_s27, 4  ;;  %s75_s30 = sshll.u32 %s1169_s29, 4  ;;  %s48_s28 = int_to_ptr.vmem [resolvable:$true] %s47_s28  ;;  %s76_s30 = int_to_ptr.vmem [resolvable:$true] %s75_s30 }
  0x37   :  { %s1087_s13 = scalar_lea.hbm %s1343_s3, 2048 }
  0x38   :  { %p1088_p10 = scmp.ne.s32.totalorder %s1343_s3, %s1087_s13  ;;  %p1091_p11 = scmp.lt.u32.totalorder %s1087_s13, %s1343_s3 }
  0x3a   :  { %p1093_p12 = pnand %p1091_p11, %p1088_p10 }
  0x3c   :  { %1096 = shalt.err (!%p1093_p12)
}
  0x3d   :  { %s1097_s0 = scalar_lea.vmem %s48_s28, 2048  ;;  %p1102_p0 = scmp.lt.s32.totalorder %s48_s28, %s48_s28 }
  0x3e   :  { %p1098_p13 = scmp.ne.s32.totalorder %s48_s28, %s1097_s0  ;;  %p1103_p1 = scmp.lt.s32.totalorder %s1097_s0, %s1097_s0 }
  0x40   :  { %p1104_p2 = por %p1103_p1, %p1102_p0 }
  0x42   :  { %p1105_p3 = pnand %p1104_p2, %p1098_p13 }
  0x44   :  { %1108 = shalt.err (!%p1105_p3)
}
  0x45   :  { %53 = dma.hbm_to_vmem [thread:$0]  %s1343_s3, 2048, %s48_s28, [#allocation6], %s1166_s10, %s1166_s10, %s1167_s14  }
  0x46   :  { %s1109_s21 = scalar_lea.hbm %s1347_s7, 1024 }
  0x47   :  { %p1110_p4 = scmp.ne.s32.totalorder %s1347_s7, %s1109_s21  ;;  %p1113_p5 = scmp.lt.u32.totalorder %s1109_s21, %s1347_s7 }
  0x49   :  { %p1115_p6 = pnand %p1113_p5, %p1110_p4 }
  0x4b   :  { %1118 = shalt.err (!%p1115_p6)
}
  0x4c   :  { %s1119_s24 = scalar_lea.vmem %s76_s30, 1024  ;;  %p1124_p8 = scmp.lt.s32.totalorder %s76_s30, %s76_s30 }
  0x4d   :  { %p1120_p7 = scmp.ne.s32.totalorder %s76_s30, %s1119_s24  ;;  %p1125_p9 = scmp.lt.s32.totalorder %s1119_s24, %s1119_s24 }
  0x4f   :  { %p1126_p10 = por %p1125_p9, %p1124_p8 }
  0x51   :  { %p1127_p11 = pnand %p1126_p10, %p1120_p7 }
  0x53   :  { %1130 = shalt.err (!%p1127_p11)
}
  0x54   :  { %81 = dma.hbm_to_vmem [thread:$0]  %s1347_s7, 1024, %s76_s30, [#allocation9], %s1166_s10, %s1166_s10, %s1167_s14  }
  0x55   :  { %1153 = dma.done.wait [#allocation3], 128  }
  0x56   :  { %1154 = vsyncadd [#allocation3], 4294967168 }
  0x57   :  { %1155 = dma.done.wait [#allocation6], 6144  }
  0x58   :  { %1156 = vsyncadd [#allocation6], 4294961152 }
  0x59   :  { %1157 = dma.done.wait [#allocation9], 2048  }
  0x5a   :  { %1158 = vsyncadd [#allocation9], 4294965248  ;;  %v937_v0 = vld [vmem:[#allocation5 + $0x4] ss:$8 sps:$4 sm:$0xff]   ;;  %v939_v1 = vld [vmem:[#allocation5] ss:$8 sps:$4 sm:$0xff]   ;;  %v135_v52 = vlaneseq }
  0x5b   :  { %312 = vmatprep.subr.bf16.mxu0 %v937_v0  ;;  %v940_v2 = vld [vmem:[#allocation5 + $0x14] ss:$8 sps:$4 sm:$0xff]   ;;  %v942_v3 = vld [vmem:[#allocation5 + $0x10] ss:$8 sps:$4 sm:$0xff]   ;;  %v943_v4 = vld [vmem:[#allocation5 + $0x24] ss:$8 sps:$4 sm:$0xff]  }
  0x5c   :  { %313 = vmatpush1.bf16.msra.mxu0 %v939_v1  ;;  %v945_v5 = vld [vmem:[#allocation5 + $0x20] ss:$8 sps:$4 sm:$0xff]   ;;  %v946_v6 = vld [vmem:[#allocation5 + $0x34] ss:$8 sps:$4 sm:$0xff]   ;;  %v948_v7 = vld [vmem:[#allocation5 + $0x30] ss:$8 sps:$4 sm:$0xff]  }
  0x5d   :  { %314 = vmatprep.subr.bf16.mxu0 %v940_v2  ;;  %v949_v8 = vld [vmem:[#allocation5 + $0x44] ss:$8 sps:$4 sm:$0xff]   ;;  %v951_v9 = vld [vmem:[#allocation5 + $0x40] ss:$8 sps:$4 sm:$0xff]   ;;  %v952_v10 = vld [vmem:[#allocation5 + $0x54] ss:$8 sps:$4 sm:$0xff]  }
  0x5e   :  { %v954_v11 = vld [vmem:[#allocation5 + $0x50] ss:$8 sps:$4 sm:$0xff]   ;;  %v955_v12 = vld [vmem:[#allocation5 + $0x64] ss:$8 sps:$4 sm:$0xff]   ;;  %v957_v13 = vld [vmem:[#allocation5 + $0x60] ss:$8 sps:$4 sm:$0xff]  }
  0x5f   :  { %v1292_v14 = vld [vmem:[#allocation2] sm:$0xff]  ;;  %v987_v17 = vld [vmem:[#allocation7 + $0x40] sm:$0xff]   ;;  %v989_v19 = vld [vmem:[#allocation7 + $0x48] sm:$0xff]   ;;  %v1170_v51 = vmov 0.0   ;;  %v136_v53 = vshrl.u32 %v135_v52, 7  ;;  %vm1171_vm0 = vmmov 0  }
  0x60   :  { %315 = vmatpush1.bf16.msra.mxu0 %v942_v3  ;;  %v958_v15 = vld [vmem:[#allocation5 + $0x74] ss:$8 sps:$4 sm:$0xff]   ;;  %v777_v16 = vcombine.high %v1292_v14, %v1292_v14  ;;  %v988_v18 = vld [vmem:[#allocation7] sm:$0xff]   ;;  %v960_v20 = vld [vmem:[#allocation5 + $0x70] ss:$8 sps:$4 sm:$0xff]   ;;  %845 = vmatprep.subr.bf16.mxu1 %v987_v17  ;;  %v776_v46 = vcombine.low %v1292_v14, %v1292_v14  ;;  %s1172_s11 = smov [#allocation11]  }
  0x61   :  { %316 = vmatprep.subr.bf16.mxu0 %v943_v4  ;;  %846 = vmatpush3.bf16.msra.mxu1 %v988_v18  ;;  %v990_v21 = vld [vmem:[#allocation7 + $0x8] sm:$0xff]   ;;  %v991_v22 = vld [vmem:[#allocation7 + $0x50] sm:$0xff]   ;;  %v993_v26 = vld [vmem:[#allocation7 + $0x58] sm:$0xff]   ;;  %v137_v54 = vsub.s32 0, %v136_v53  ;;  %v141_v56 = vsub.s32 1, %v136_v53  ;;  %s765_s12 = sshll.u32 %s1172_s11, 4  ;;  %s766_s12 = int_to_ptr.vmem [resolvable:$true] %s765_s12 }
  0x62   :  { %344 = vmatprep.mubr.bf16.mxu0 %v777_v16  ;;  %847 = vmatprep.subr.bf16.mxu1 %v989_v19  ;;  %v961_v23 = vld [vmem:[#allocation5 + $0x84] ss:$8 sps:$4 sm:$0xff]   ;;  %v963_v24 = vld [vmem:[#allocation5 + $0x80] ss:$8 sps:$4 sm:$0xff]   ;;  %v992_v25 = vld [vmem:[#allocation7 + $0x10] sm:$0xff]   ;;  %p1136_p13 = scmp.lt.s32.totalorder %s766_s12, %s766_s12 }
  0x63   :  { %v964_v27 = vld [vmem:[#allocation5 + $0x94] ss:$8 sps:$4 sm:$0xff]   ;;  %v966_v28 = vld [vmem:[#allocation5 + $0x90] ss:$8 sps:$4 sm:$0xff]   ;;  %v995_v30 = vld [vmem:[#allocation7 + $0x60] sm:$0xff]  }
  0x64   :  { %317 = vmatpush1.bf16.msra.mxu0 %v945_v5  ;;  %v994_v29 = vld [vmem:[#allocation7 + $0x18] sm:$0xff]   ;;  %v967_v31 = vld [vmem:[#allocation5 + $0xa4] ss:$8 sps:$4 sm:$0xff]   ;;  %v969_v33 = vld [vmem:[#allocation5 + $0xa0] ss:$8 sps:$4 sm:$0xff]  }
  0x65   :  { %318 = vmatprep.subr.bf16.mxu0 %v946_v6  ;;  %848 = vmatpush3.bf16.msra.mxu1 %v990_v21  ;;  %v996_v32 = vld [vmem:[#allocation7 + $0x20] sm:$0xff]   ;;  %v997_v34 = vld [vmem:[#allocation7 + $0x68] sm:$0xff]   ;;  %v970_v35 = vld [vmem:[#allocation5 + $0xb4] ss:$8 sps:$4 sm:$0xff]  }
  0x66   :  { %849 = vmatprep.subr.bf16.mxu1 %v991_v22  ;;  %v998_v36 = vld [vmem:[#allocation7 + $0x28] sm:$0xff]   ;;  %v972_v37 = vld [vmem:[#allocation5 + $0xb0] ss:$8 sps:$4 sm:$0xff]   ;;  %v976_v40 = vld [vmem:[#allocation5 + $0xd4] ss:$8 sps:$4 sm:$0xff]  }
  0x67   :  { %v973_v38 = vld [vmem:[#allocation5 + $0xc4] ss:$8 sps:$4 sm:$0xff]   ;;  %v975_v39 = vld [vmem:[#allocation5 + $0xc0] ss:$8 sps:$4 sm:$0xff]   ;;  %v978_v41 = vld [vmem:[#allocation5 + $0xd0] ss:$8 sps:$4 sm:$0xff]  }
  0x68   :  { %319 = vmatpush1.bf16.msra.mxu0 %v948_v7  ;;  %v979_v42 = vld [vmem:[#allocation5 + $0xe4] ss:$8 sps:$4 sm:$0xff]   ;;  %v981_v43 = vld [vmem:[#allocation5 + $0xe0] ss:$8 sps:$4 sm:$0xff]   ;;  %v982_v44 = vld [vmem:[#allocation5 + $0xf4] ss:$8 sps:$4 sm:$0xff]  }
  0x69   :  { %320 = vmatprep.subr.bf16.mxu0 %v949_v8  ;;  %850 = vmatpush3.bf16.msra.mxu1 %v992_v25  ;;  %v984_v45 = vld [vmem:[#allocation5 + $0xf0] ss:$8 sps:$4 sm:$0xff]   ;;  %v1003_v4 = vld [vmem:[#allocation8] sm:$0xff]   ;;  %v1004_v6 = vld [vmem:[#allocation8 + $0x8] sm:$0xff]  }
  0x6a   :  { %851 = vmatprep.subr.bf16.mxu1 %v993_v26  ;;  %v999_v47 = vld [vmem:[#allocation7 + $0x70] sm:$0xff]   ;;  %v1001_v49 = vld [vmem:[#allocation7 + $0x78] sm:$0xff]   ;;  %v1012_v14 = vld [vmem:[#allocation10 + $0x8] sm:$0xff]  }
  0x6b   :  { %v1000_v48 = vld [vmem:[#allocation7 + $0x30] sm:$0xff]   ;;  %v1002_v50 = vld [vmem:[#allocation7 + $0x38] sm:$0xff]   ;;  %v1015_v26 = vld [vmem:[#allocation10 + $0x20] sm:$0xff]  }
  0x6c   :  { %321 = vmatpush1.bf16.msra.mxu0 %v951_v9  ;;  %v133_v55 = vld [vmem:[%s1342_s2] sm:$0x3]  ;;  %v1005_v7 = vld [vmem:[#allocation8 + $0x10] sm:$0xff]   ;;  %v1007_v9 = vld [vmem:[#allocation8 + $0x20] sm:$0xff]  }
  0x6d   :  { %322 = vmatprep.subr.bf16.mxu0 %v952_v10  ;;  %852 = vmatpush3.bf16.msra.mxu1 %v994_v29  ;;  %v138_v57 = vrot.slane %v133_v55, %v137_v54  ;;  %v142_v58 = vrot.slane %v133_v55, %v141_v56  ;;  %v1006_v8 = vld [vmem:[#allocation8 + $0x18] sm:$0xff]   ;;  %v1008_v10 = vld [vmem:[#allocation8 + $0x28] sm:$0xff]  }
  0x6e   :  { %853 = vmatprep.subr.bf16.mxu1 %v995_v30  ;;  %v1014_v16 = vld [vmem:[#allocation10 + $0x18] sm:$0xff]  }
  0x6f   :  { %v810_v18 = vld [vmem:[%s1344_s4] ss:$0 sm:$0xff] }
  0x70   :  { %323 = vmatpush1.bf16.msra.mxu0 %v954_v11  ;;  %v1009_v11 = vld [vmem:[#allocation8 + $0x30] sm:$0xff]   ;;  %v1018_v29 = vld [vmem:[#allocation10 + $0x38] sm:$0xff]  }
  0x71   :  { %324 = vmatprep.subr.bf16.mxu0 %v955_v12  ;;  %854 = vmatpush3.bf16.msra.mxu1 %v996_v32  ;;  %v1010_v12 = vld [vmem:[#allocation8 + $0x38] sm:$0xff]  }
  0x72   :  { %855 = vmatprep.subr.bf16.mxu1 %v997_v34  ;;  %v827_v30 = vld [vmem:[%s1346_s6] ss:$0 sm:$0xff]  ;;  %s1131_s6 = scalar_lea.vmem %s766_s12, 128 }
  0x73   :  { %p1132_p12 = scmp.ne.s32.totalorder %s766_s12, %s1131_s6  ;;  %p1137_p0 = scmp.lt.s32.totalorder %s1131_s6, %s1131_s6 }
  0x74   :  { %325 = vmatpush1.bf16.msra.mxu0 %v957_v13  ;;  %v1011_v13 = vld [vmem:[#allocation10] sm:$0xff]  }
  0x75   :  { %326 = vmatprep.subr.bf16.mxu0 %v958_v15  ;;  %856 = vmatpush3.bf16.msra.mxu1 %v998_v36  ;;  %v1013_v15 = vld [vmem:[#allocation10 + $0x10] sm:$0xff]   ;;  %p1138_p1 = por %p1137_p0, %p1136_p13 }
  0x76   :  { %857 = vmatprep.subr.bf16.mxu1 %v999_v47 }
  0x77   :  { %p1139_p2 = pnand %p1138_p1, %p1132_p12 }
  0x78   :  { %327 = vmatpush1.bf16.msra.mxu0 %v960_v20 }
  0x79   :  { %328 = vmatprep.subr.bf16.mxu0 %v961_v23  ;;  %858 = vmatpush3.bf16.msra.mxu1 %v1000_v48 }
  0x7a   :  { %859 = vmatprep.subr.bf16.mxu1 %v1001_v49 }
  0x7c   :  { %329 = vmatpush1.bf16.msra.mxu0 %v963_v24 }
  0x7d   :  { %330 = vmatprep.subr.bf16.mxu0 %v964_v27  ;;  %860 = vmatpush3.bf16.msra.mxu1 %v1002_v50  ;;  %v1016_v27 = vld [vmem:[#allocation10 + $0x28] sm:$0xff]  }
  0x7e   :  { %885 = vmatprep.subr.bf16.mxu1 %v1170_v51 }
  0x80   :  { %331 = vmatpush1.bf16.msra.mxu0 %v966_v28  ;;  %v1017_v28 = vld [vmem:[#allocation10 + $0x30] sm:$0xff]  }
  0x81   :  { %332 = vmatprep.subr.bf16.mxu0 %v967_v31 }
  0x84   :  { %333 = vmatpush1.bf16.msra.mxu0 %v969_v33 }
  0x85   :  { %334 = vmatprep.subr.bf16.mxu0 %v970_v35 }
  0x88   :  { %335 = vmatpush1.bf16.msra.mxu0 %v972_v37 }
  0x89   :  { %336 = vmatprep.subr.bf16.mxu0 %v973_v38  ;;  %v836_v38 = vld [vmem:[%s1348_s8] ss:$0 sm:$0xff] }
  0x8c   :  { %337 = vmatpush1.bf16.msra.mxu0 %v975_v39 }
  0x8d   :  { %338 = vmatprep.subr.bf16.mxu0 %v976_v40 }
  0x90   :  { %339 = vmatpush1.bf16.msra.mxu0 %v978_v41 }
  0x91   :  { %340 = vmatprep.subr.bf16.mxu0 %v979_v42 }
  0x94   :  { %341 = vmatpush1.bf16.msra.mxu0 %v981_v43 }
  0x95   :  { %342 = vmatprep.subr.bf16.mxu0 %v982_v44 }
  0x98   :  { %343 = vmatpush1.bf16.msra.mxu0 %v984_v45 }
  0x99   :  { %905 = vmatprep.subr.bf16.mxu0 %v1170_v51 }
  0x9b   :  { %345 = vmatmul.mubr.bf16.vlgmr.msra.gmra.mrb[0].mxu0 %v776_v46 }
  0x9c   :  { %921 = vmatprep.mubr.msk.bf16.mxu0 %vm1171_vm0, %v1170_v51  ;;  %906 = vmatpush3.bf16.msra.mxu0 %v1011_v13 }
  0x9d   :  { %907 = vmatprep.subr.bf16.mxu0 %v1170_v51 }
  0xa0   :  { %908 = vmatpush3.bf16.msra.mxu0 %v1012_v14 }
  0xa1   :  { %909 = vmatprep.subr.bf16.mxu0 %v1170_v51 }
  0xa4   :  { %910 = vmatpush3.bf16.msra.mxu0 %v1013_v15 }
  0xa5   :  { %911 = vmatprep.subr.bf16.mxu0 %v1170_v51 }
  0xa8   :  { %912 = vmatpush3.bf16.msra.mxu0 %v1014_v16 }
  0xa9   :  { %913 = vmatprep.subr.bf16.mxu0 %v1170_v51 }
  0xac   :  { %914 = vmatpush3.bf16.msra.mxu0 %v1015_v26 }
  0xad   :  { %915 = vmatprep.subr.bf16.mxu0 %v1170_v51 }
  0xb0   :  { %916 = vmatpush3.bf16.msra.mxu0 %v1016_v27 }
  0xb1   :  { %917 = vmatprep.subr.bf16.mxu0 %v1170_v51 }
  0xb4   :  { %918 = vmatpush3.bf16.msra.mxu0 %v1017_v28 }
  0xb5   :  { %919 = vmatprep.subr.bf16.mxu0 %v1170_v51 }
  0xb8   :  { %920 = vmatpush3.bf16.msra.mxu0 %v1018_v29 }
 0x16e   :  { %v346_v59 = vpop.f32.mrb[0].mxu0 }
 0x16f   :  { %v347_v60 = vadd.f32 %v346_v59, %v138_v57  ;;  %v348_v61 = vpop.f32.mrb[1].mxu0 }
 0x170   :  { %v349_v62 = vadd.f32 %v348_v61, %v142_v58  ;;  %v350_v63 = vpop.f32.mrb[2].mxu0 }
 0x171   :  { %v353_v0 = vmax.f32 %v347_v60, 0.0  ;;  %v351_v1 = vpop.f32.mrb[3].mxu0 }
 0x172   :  { %v354_v2 = vmax.f32 %v349_v62, 0.0 }
 0x173   :  { %v355_v5 = vpack.c.bf16 %v353_v0, %v353_v0 }
 0x174   :  { %v356_v3 = vpack.c.bf16 %v354_v2, %v354_v2 }
 0x176   :  { %524 = vmatprep.mubr.bf16.mxu1 %v356_v3 }
 0x177   :  { %525 = vmatmul.mubr.bf16.vlgmr.msra.gmra.mrb[0].mxu1 %v355_v5 }
 0x178   :  { %886 = vmatpush3.bf16.msra.mxu1 %v1003_v4  ;;  %901 = vmatprep.mubr.msk.bf16.mxu1 %vm1171_vm0, %v1170_v51 }
 0x179   :  { %887 = vmatprep.subr.bf16.mxu1 %v1170_v51 }
 0x17c   :  { %888 = vmatpush3.bf16.msra.mxu1 %v1004_v6 }
 0x17d   :  { %889 = vmatprep.subr.bf16.mxu1 %v1170_v51 }
 0x180   :  { %890 = vmatpush3.bf16.msra.mxu1 %v1005_v7 }
 0x181   :  { %891 = vmatprep.subr.bf16.mxu1 %v1170_v51 }
 0x184   :  { %892 = vmatpush3.bf16.msra.mxu1 %v1006_v8 }
 0x185   :  { %893 = vmatprep.subr.bf16.mxu1 %v1170_v51 }
 0x188   :  { %894 = vmatpush3.bf16.msra.mxu1 %v1007_v9 }
 0x189   :  { %895 = vmatprep.subr.bf16.mxu1 %v1170_v51 }
 0x18c   :  { %896 = vmatpush3.bf16.msra.mxu1 %v1008_v10 }
 0x18d   :  { %897 = vmatprep.subr.bf16.mxu1 %v1170_v51 }
 0x190   :  { %898 = vmatpush3.bf16.msra.mxu1 %v1009_v11 }
 0x191   :  { %899 = vmatprep.subr.bf16.mxu1 %v1170_v51 }
 0x194   :  { %900 = vmatpush3.bf16.msra.mxu1 %v1010_v12 }
 0x24a   :  { %v861_v17 = vpop.f32.mrb[0].mxu1 }
 0x24b   :  { %v862_v19 = vpop.f32.mrb[1].mxu1 }
 0x24c   :  { %v863_v20 = vadd.f32 %v862_v19, %v861_v17  ;;  %v864_v21 = vpop.f32.mrb[2].mxu1 }
 0x24d   :  { %v865_v22 = vpop.f32.mrb[3].mxu1 }
 0x24e   :  { %v527_v23 = vadd.f32 %v863_v20, %v810_v18 }
 0x250   :  { %v532_v24 = vmax.f32 %v527_v23, 0.0 }
 0x252   :  { %v533_v25 = vpack.c.bf16 %v532_v24, %v532_v24 }
 0x254   :  { %902 = vmatmul.mubr.bf16.vlgmr.msra.gmra.mrb[4].mxu1 %v533_v25 }
 0x327   :  { %v639_v31 = vpop.f32.mrb[4].mxu1 }
 0x328   :  { %v640_v32 = vadd.f32 %v827_v30, %v639_v31  ;;  %v903_v33 = vpop.f32.mrb[5].mxu1 }
 0x329   :  { %v642_v34 = vpop.f32.mrb[6].mxu1 }
 0x32a   :  { %1019 = vtanh.f32 %v640_v32  ;;  %v904_v35 = vpop.f32.mrb[7].mxu1 }
 0x334   :  { %v1020_v36 = vpop.eup %1019 }
 0x335   :  { %v646_v37 = vpack.c.bf16 %v1020_v36, %v1020_v36 }
 0x337   :  { %922 = vmatmul.mubr.bf16.vlgmr.msra.gmra.mrb[4].mxu0 %v646_v37 }
 0x40a   :  { %v752_v39 = vpop.f32.mrb[4].mxu0 }
 0x40b   :  { %v753_v40 = vadd.f32 %v836_v38, %v752_v39  ;;  %v923_v41 = vpop.f32.mrb[5].mxu0 }
 0x40c   :  { %v755_v42 = vpop.f32.mrb[6].mxu0 }
 0x40d   :  { %758 = vst [vmem:[#allocation11] sm:$0xff] %v753_v40  ;;  %v924_v43 = vpop.f32.mrb[7].mxu0 }
 0x40e   :  { %1142 = shalt.err (!%p1139_p2)
}
 0x40f   :  { %s1143_s8 = scalar_lea.hbm %s1349_s9, 128 }
 0x410   :  { %p1144_p3 = scmp.ne.s32.totalorder %s1349_s9, %s1143_s8  ;;  %p1147_p4 = scmp.lt.u32.totalorder %s1143_s8, %s1349_s9 }
 0x412   :  { %p1149_p5 = pnand %p1147_p4, %p1144_p3 }
 0x414   :  { %1152 = shalt.err (!%p1149_p5)
}
 0x415   :  { %768 = dma.vmem_to_hbm [thread:$0]  %s766_s12, 128, %s1349_s9, [#allocation4]  }
 0x416   :  { %1159 = dma.done.wait [#allocation4], 128  }
 0x417   :  { %1160 = vsyncadd [#allocation4], 4294967168 }
 0x418   :  { %772 = vsyncpa [#allocation3], 1 }
 0x419   :  { %773 = vsyncpa [#allocation6], 1 }
 0x41a   :  { %774 = vsyncpa [#allocation9], 1 }
 0x41b   :  { %775 = vsyncpa [#allocation4], 1 }

</bundles_post_ra>
